<compile_context>
chip_gen: v7x
topology: tpu7x:2x2x1
jax: 0.10.0
libtpu: 0.0.40
codegen_flags: <defaults>
</compile_context>

<pallas_src>
import math
import jax
import jax.numpy as jnp
from jax.experimental import pallas as pl
from jax.experimental.pallas import tpu as pltpu


def _round_up(x, m):
    return ((x + m - 1) // m) * m


def _detect_buffered_support():
    """Feature-detect BlockSpec(pipeline_mode=pl.Buffered(1)) once at import."""
    if not hasattr(pl, "Buffered"):
        return False
    try:
        pl.BlockSpec((8, 128), lambda i: (0, 0), pipeline_mode=pl.Buffered(1))
        return True
    except TypeError:
        return False


_HAS_BUFFERED = _detect_buffered_support()


def _vmem_limit_bytes():
    """Generation-aware VMEM limit: ~50 MiB on 64-MiB v7x, ~100 MiB on 128-MiB v5e/v6e."""
    cap = None
    try:
        cap = getattr(pltpu.get_tpu_info(), "vmem_capacity_bytes", None)
    except Exception:
        cap = None
    if not cap:
        cap = 64 << 20  # conservative default (v7x per-TC VMEM)
    limit = min(int(cap * 0.78), cap - (8 << 20))  # headroom for Mosaic scratch
    return max(limit, 32 << 20)


def densenet_kernel(x_ref, w1_ref, b1_ref, w2_ref, b2_ref, o_ref):
    """Fused Linear -> ReLU -> Linear -> ReLU on one (tile_b, dim_in) slab of x.

    x is cast to the weight dtype (bf16) in-kernel (VPU) so the wrapper never
    materializes a padded/cast copy of x in HBM.  Both matmuls run on the MXU
    with f32 accumulation; bias adds + ReLUs are f32 VPU ops.
    """
    x = x_ref[...].astype(w1_ref.dtype)
    h = jnp.dot(x, w1_ref[...], preferred_element_type=jnp.float32)
    h = jnp.maximum(h + b1_ref[...], 0.0)                       # (tb, 256) f32
    y = jnp.dot(h.astype(w2_ref.dtype), w2_ref[...],
                preferred_element_type=jnp.float32)
    y = jnp.maximum(y + b2_ref[...], 0.0)                       # (tb, 128) f32
    o_ref[...] = y.astype(o_ref.dtype)


def _pick_tile_b(B, dim_in, H1, H2, x_itemsize, out_itemsize, vmem_limit,
                 single_buffer_weights, requested=None):
    """Largest roofline-friendly batch tile that fits the VMEM budget."""
    sub = 16  # sublane multiple, safe for f32 and bf16 blocks
    if requested is not None:
        return max(sub, _round_up(requested, sub))

    budget = vmem_limit - (6 << 20)          # leave room for internal scratch
    tile_b = min(4096, _round_up(B, sub))    # large tiles amortize ~0.35us/step
    weights = dim_in * H1 * 2 + H1 * H2 * 2 + (H1 + H2) * 4
    if not single_buffer_weights:
        weights *= 2

    while tile_b > sub:
        per_step = (2 * tile_b * dim_in * x_itemsize       # x tile, double-buffered
                    + 2 * tile_b * H2 * out_itemsize       # out tile, double-buffered
                    + tile_b * H1 * 4                      # f32 hidden
                    + tile_b * (dim_in * 2 + H1 * 2 + H2 * 4)  # in-kernel casts / f32 y
                    + weights)
        if per_step <= budget:
            break
        tile_b = max(sub, _round_up(tile_b // 2, sub))

    # v7x megacore: keep >= 2 grid steps so both TensorCores get work, but only
    # when the batch is large enough that the extra step overhead is negligible
    # (no measurable cost on single-TC v5e/v6e).
    if B >= 2048 and pl.cdiv(B, tile_b) < 2:
        tile_b = _round_up(pl.cdiv(B, 2), sub)
    return max(sub, tile_b)


def _densenet_pallas(x, w1_c, b1_c, w2_c, b2_c, *, tile_b, out_dtype,
                     vmem_limit, single_buffer_weights):
    B, dim_in = x.shape
    H1 = w1_c.shape[1]
    H2 = w2_c.shape[1]
    grid = (pl.cdiv(B, tile_b),)   # ragged last block: input pad is garbage but
                                   # only feeds dropped output rows (rows independent)

    # Weights/biases have constant index_maps -> resident across the grid;
    # single-buffer them when supported to halve their VMEM footprint.
    resident = ({"pipeline_mode": pl.Buffered(1)}
                if (single_buffer_weights and _HAS_BUFFERED) else {})

    out_isz = jnp.dtype(out_dtype).itemsize
    bytes_accessed = (x.size * x.dtype.itemsize
                      + w1_c.size * w1_c.dtype.itemsize
                      + w2_c.size * w2_c.dtype.itemsize
                      + b1_c.size * 4 + b2_c.size * 4
                      + B * H2 * out_isz)
    cost = pl.CostEstimate(
        flops=2 * B * (dim_in * H1 + H1 * H2),
        transcendentals=0,
        bytes_accessed=bytes_accessed,
    )

    return pl.pallas_call(
        densenet_kernel,
        out_shape=jax.ShapeDtypeStruct((B, H2), out_dtype),
        grid_spec=pltpu.PrefetchScalarGridSpec(
            num_scalar_prefetch=0,
            grid=grid,
            in_specs=[
                # x tile: last dim = full dim_in (legal even when < 128), so no
                # column padding and no masked lane waste beyond the real data.
                pl.BlockSpec((tile_b, dim_in), lambda i: (i, 0)),
                pl.BlockSpec((dim_in, H1), lambda i: (0, 0), **resident),  # W1
                pl.BlockSpec((1, H1), lambda i: (0, 0), **resident),       # b1
                pl.BlockSpec((H1, H2), lambda i: (0, 0), **resident),      # W2
                pl.BlockSpec((1, H2), lambda i: (0, 0), **resident),       # b2
            ],
            out_specs=pl.BlockSpec((tile_b, H2), lambda i: (i, 0)),
        ),
        compiler_params=pltpu.CompilerParams(
            dimension_semantics=("parallel",),   # shards grid steps across v7x TCs
            vmem_limit_bytes=vmem_limit,
        ),
        cost_estimate=cost,
    )(x, w1_c, b1_c, w2_c, b2_c)


def densenet_forward(x, w1, b1, w2, b2, *, tile_b=None,
                     compute_dtype=jnp.bfloat16, out_dtype=None):
    """x: (B, dim_in); w1: (dim_in, 256); b1: (1, 256); w2: (256, 128); b2: (1, 128).

    Default is bf16 compute + bf16 output (fastest, mem-bound regime); pass
    compute_dtype=out_dtype=jnp.float32 for full f32 parity with nn.Linear.
    """
    B, dim_in = x.shape
    H1 = w1.shape[1]
    H2 = w2.shape[1]
    out_dtype = compute_dtype if out_dtype is None else out_dtype

    # Weights are tiny relative to activations: cast them once in the wrapper.
    # x is passed through untouched (cast happens in-kernel).
    w1_c = w1.astype(compute_dtype)
    w2_c = w2.astype(compute_dtype)
    b1_c = b1.reshape(1, H1).astype(jnp.float32)
    b2_c = b2.reshape(1, H2).astype(jnp.float32)

    vmem_limit = _vmem_limit_bytes()
    tb = _pick_tile_b(B, dim_in, H1, H2, x.dtype.itemsize,
                      jnp.dtype(out_dtype).itemsize, vmem_limit,
                      single_buffer_weights=_HAS_BUFFERED, requested=tile_b)

    try:
        return _densenet_pallas(x, w1_c, b1_c, w2_c, b2_c, tile_b=tb,
                                out_dtype=out_dtype, vmem_limit=vmem_limit,
                                single_buffer_weights=True)
    except Exception as e:
        # Narrow fallback: only retry (with double-buffered resident weights)
        # when the failure is about pipeline_mode / Buffered support.
        msg = str(e).lower()
        if _HAS_BUFFERED and ("pipeline" in msg or "buffer" in msg):
            return _densenet_pallas(x, w1_c, b1_c, w2_c, b2_c, tile_b=tb,
                                    out_dtype=out_dtype, vmem_limit=vmem_limit,
                                    single_buffer_weights=False)
        raise


def init_densenet_params(key, dim_in, h1=256, h2=128, dtype=jnp.float32):
    """Deterministic init matching PyTorch nn.Linear default (Kaiming-uniform-ish)."""
    k1, k2, k3, k4 = jax.random.split(key, 4)
    bound1 = 1.0 / math.sqrt(dim_in)
    bound2 = 1.0 / math.sqrt(h1)
    w1 = jax.random.uniform(k1, (dim_in, h1), dtype, -bound1, bound1)
    b1 = jax.random.uniform(k2, (1, h1), dtype, -bound1, bound1)
    w2 = jax.random.uniform(k3, (h1, h2), dtype, -bound2, bound2)
    b2 = jax.random.uniform(k4, (1, h2), dtype, -bound2, bound2)
    return w1, b1, w2, b2


if __name__ == "__main__":
    key = jax.random.PRNGKey(0)
    kx, kp = jax.random.split(key)

    batch, dim_in = 8, 32
    x = jax.random.normal(kx, (batch, dim_in), jnp.float32)
    w1, b1, w2, b2 = init_densenet_params(kp, dim_in)

    out = jax.block_until_ready(densenet_forward(x, w1, b1, w2, b2))
    assert out.shape == (batch, 128)
    out32 = out.astype(jnp.float32)

    # Reference with the same bf16-weights / f32-accumulate flow as the kernel.
    xb, w1b, w2b = (a.astype(jnp.bfloat16) for a in (x, w1, w2))
    h_ref = jnp.maximum(jnp.dot(xb, w1b, preferred_element_type=jnp.float32) + b1, 0.0)
    ref = jnp.maximum(jnp.dot(h_ref.astype(jnp.bfloat16), w2b,
                              preferred_element_type=jnp.float32) + b2, 0.0)
    assert jnp.allclose(out32, ref, atol=2e-2, rtol=2e-2), \
        float(jnp.max(jnp.abs(out32 - ref)))

    # Sanity check against the pure-f32 PyTorch-equivalent math (bf16-level tol).
    ref32 = jnp.maximum(jnp.maximum(x @ w1 + b1, 0.0) @ w2 + b2, 0.0)
    assert jnp.allclose(out32, ref32, atol=5e-2, rtol=5e-2), \
        float(jnp.max(jnp.abs(out32 - ref32)))

    print("KERNEL_OK")
</pallas_src>

<mosaic_0001>
module attributes {stable_mosaic.version = 11 : i64} {
  func.func @densenet_kernel(%arg0: i32, %arg1: memref<16x32xf32, #tpu.memory_space<vmem>>, %arg2: memref<32x256xbf16, #tpu.memory_space<vmem>>, %arg3: memref<1x256xf32, #tpu.memory_space<vmem>>, %arg4: memref<256x128xbf16, #tpu.memory_space<vmem>>, %arg5: memref<1x128xf32, #tpu.memory_space<vmem>>, %arg6: memref<16x128xbf16, #tpu.memory_space<vmem>>) attributes {dimension_semantics = [#tpu.dimension_semantics<parallel>], iteration_bounds = array<i64: 1>, scalar_prefetch = 0 : i64, scratch_operands = 0 : i64, tpu.core_type = #tpu.core_type<tc>, window_params = [{transform_indices = @transform_0, window_bounds = array<i64: 16, 32>}, {pipeline_mode = #tpu.pipeline_mode<synchronous>, transform_indices = @transform_1, window_bounds = array<i64: 32, 256>}, {pipeline_mode = #tpu.pipeline_mode<synchronous>, transform_indices = @transform_2, window_bounds = array<i64: 1, 256>}, {pipeline_mode = #tpu.pipeline_mode<synchronous>, transform_indices = @transform_3, window_bounds = array<i64: 256, 128>}, {pipeline_mode = #tpu.pipeline_mode<synchronous>, transform_indices = @transform_4, window_bounds = array<i64: 1, 128>}, {transform_indices = @transform_5, window_bounds = array<i64: 16, 128>}]} {
    %c0 = arith.constant 0 : index
    %c0_0 = arith.constant 0 : index
    %0 = vector.load %arg1[%c0, %c0_0] : memref<16x32xf32, #tpu.memory_space<vmem>>, vector<16x32xf32>
    %1 = arith.truncf %0 : vector<16x32xf32> to vector<16x32xbf16>
    %c0_1 = arith.constant 0 : index
    %c0_2 = arith.constant 0 : index
    %2 = vector.load %arg2[%c0_1, %c0_2] : memref<32x256xbf16, #tpu.memory_space<vmem>>, vector<32x256xbf16>
    %cst = arith.constant dense<0.000000e+00> : vector<16x256xf32>
    %3 = tpu.matmul %1, %2, %cst {dimension_numbers = #tpu.dot_dimension_numbers<[1], [0], [0], [1], [0, 0, 1, 1], [], []>} : vector<16x32xbf16>, vector<32x256xbf16>, vector<16x256xf32> -> vector<16x256xf32>
    %c0_3 = arith.constant 0 : index
    %c0_4 = arith.constant 0 : index
    %4 = vector.load %arg3[%c0_3, %c0_4] : memref<1x256xf32, #tpu.memory_space<vmem>>, vector<1x256xf32>
    %5 = vector.broadcast %4 : vector<1x256xf32> to vector<16x256xf32>
    %6 = arith.addf %3, %5 : vector<16x256xf32>
    %cst_5 = arith.constant 0.000000e+00 : f32
    %7 = vector.broadcast %cst_5 : f32 to vector<16x256xf32>
    %8 = arith.maximumf %6, %7 : vector<16x256xf32>
    %9 = arith.truncf %8 : vector<16x256xf32> to vector<16x256xbf16>
    %c0_6 = arith.constant 0 : index
    %c0_7 = arith.constant 0 : index
    %10 = vector.load %arg4[%c0_6, %c0_7] : memref<256x128xbf16, #tpu.memory_space<vmem>>, vector<256x128xbf16>
    %cst_8 = arith.constant dense<0.000000e+00> : vector<16x128xf32>
    %11 = tpu.matmul %9, %10, %cst_8 {dimension_numbers = #tpu.dot_dimension_numbers<[1], [0], [0], [1], [0, 0, 1, 1], [], []>} : vector<16x256xbf16>, vector<256x128xbf16>, vector<16x128xf32> -> vector<16x128xf32>
    %c0_9 = arith.constant 0 : index
    %c0_10 = arith.constant 0 : index
    %12 = vector.load %arg5[%c0_9, %c0_10] : memref<1x128xf32, #tpu.memory_space<vmem>>, vector<1x128xf32>
    %13 = vector.broadcast %12 : vector<1x128xf32> to vector<16x128xf32>
    %14 = arith.addf %11, %13 : vector<16x128xf32>
    %cst_11 = arith.constant 0.000000e+00 : f32
    %15 = vector.broadcast %cst_11 : f32 to vector<16x128xf32>
    %16 = arith.maximumf %14, %15 : vector<16x128xf32>
    %17 = arith.truncf %16 : vector<16x128xf32> to vector<16x128xbf16>
    %c0_12 = arith.constant 0 : index
    %c0_13 = arith.constant 0 : index
    %18 = vector.load %arg6[%c0_12, %c0_13] : memref<16x128xbf16, #tpu.memory_space<vmem>>, vector<16x128xbf16>
    tpu.vector_store %arg6[%c0_12, %c0_13], %17 {strides = array<i32>} : memref<16x128xbf16, #tpu.memory_space<vmem>>, vector<16x128xbf16>,
    return
  }
  func.func @transform_0(%arg0: i32) -> (i32, i32) {
    %c0_i32 = arith.constant 0 : i32
    %c0_i32_0 = arith.constant 0 : i32
    return %arg0, %c0_i32 : i32, i32
  }
  func.func @transform_1(%arg0: i32) -> (i32, i32) {
    %c0_i32 = arith.constant 0 : i32
    %c0_i32_0 = arith.constant 0 : i32
    %c0_i32_1 = arith.constant 0 : i32
    return %c0_i32, %c0_i32_0 : i32, i32
  }
  func.func @transform_2(%arg0: i32) -> (i32, i32) {
    %c0_i32 = arith.constant 0 : i32
    %c0_i32_0 = arith.constant 0 : i32
    %c0_i32_1 = arith.constant 0 : i32
    return %c0_i32, %c0_i32_0 : i32, i32
  }
  func.func @transform_3(%arg0: i32) -> (i32, i32) {
    %c0_i32 = arith.constant 0 : i32
    %c0_i32_0 = arith.constant 0 : i32
    %c0_i32_1 = arith.constant 0 : i32
    return %c0_i32, %c0_i32_0 : i32, i32
  }
  func.func @transform_4(%arg0: i32) -> (i32, i32) {
    %c0_i32 = arith.constant 0 : i32
    %c0_i32_0 = arith.constant 0 : i32
    %c0_i32_1 = arith.constant 0 : i32
    return %c0_i32, %c0_i32_0 : i32, i32
  }
  func.func @transform_5(%arg0: i32) -> (i32, i32) {
    %c0_i32 = arith.constant 0 : i32
    %c0_i32_0 = arith.constant 0 : i32
    return %arg0, %c0_i32 : i32, i32
  }
}

</mosaic_0001>

<bundles_post_ra>
// kernel: tpu_custom_call.1
= control target key start
LH: loop header
LB: loop body
LE: loop exit
PB: predicated region body
PF: predicated region fallthrough
CT: control target
= control target key end

     0   :  { %10 = vsyncpa [#allocation3], 0  ;;  %s646_s0 = inlined_call_operand.hbm [shape: f32[8,32], index: 0, kind: input, shape index: {}]   ;;  %s647_s1 = inlined_call_operand.hbm [shape: bf16[32,256], index: 1, kind: input, shape index: {}]   ;;  %s648_s2 = inlined_call_operand.vmem [shape: f32[1,256], index: 2, kind: input, shape index: {}]   ;;  %s649_s3 = inlined_call_operand.hbm [shape: bf16[256,128], index: 3, kind: input, shape index: {}]   ;;  %s650_s4 = inlined_call_operand.vmem [shape: f32[1,128], index: 4, kind: input, shape index: {}]   ;;  %s651_s5 = inlined_call_operand.hbm [shape: bf16[8,128], index: 5, kind: output, shape index: {}]  }
   0x1   :  { %11 = vsyncpa [#allocation6], 0 }
   0x2   :  { %12 = vsyncpa [#allocation4], 0 }
   0x3   :  { %17 = vsyncadd [#allocation3], 128  ;;  %s539_s18 = smov [#allocation5]   ;;  %s540_s20 = smov [#allocation2]  }
   0x4   :  { %s30_s19 = sshll.u32 %s539_s18, 4  ;;  %s18_s21 = sshll.u32 %s540_s20, 4  ;;  %s31_s19 = int_to_ptr.vmem [resolvable:$true] %s30_s19  ;;  %s578_s21 = int_to_ptr.vmem [resolvable:$true] %s18_s21 }
   0x5   :  { %s445_s24 = scalar_lea.hbm %s647_s1, 512 }
   0x6   :  { %p446_p0 = scmp.ne.s32.totalorder %s647_s1, %s445_s24  ;;  %p449_p1 = scmp.lt.u32.totalorder %s445_s24, %s647_s1 }
   0x8   :  { %p451_p2 = pnand %p449_p1, %p446_p0 }
   0xa   :  { %454 = shalt.err (!%p451_p2)
}
   0xb   :  { %s455_s29 = scalar_lea.vmem %s31_s19, 512  ;;  %p460_p4 = scmp.lt.s32.totalorder %s31_s19, %s31_s19 }
   0xc   :  { %p456_p3 = scmp.ne.s32.totalorder %s31_s19, %s455_s29  ;;  %p461_p5 = scmp.lt.s32.totalorder %s455_s29, %s455_s29 }
   0xe   :  { %p462_p6 = por %p461_p5, %p460_p4 }
  0x10   :  { %p463_p7 = pnand %p462_p6, %p456_p3 }
  0x12   :  { %466 = shalt.err (!%p463_p7)
}
  0x13   :  { %s541_s30 = smov 128   ;;  %s542_s6 = smov 8  }
  0x14   :  { %36 = dma.hbm_to_vmem [thread:$0]  %s647_s1, 512, %s31_s19, [#allocation6], %s541_s30, %s541_s30, %s542_s6  }
  0x15   :  { %s467_s11 = scalar_lea.hbm %s646_s0, 128 }
  0x16   :  { %p468_p8 = scmp.ne.s32.totalorder %s646_s0, %s467_s11  ;;  %p471_p9 = scmp.lt.u32.totalorder %s467_s11, %s646_s0 }
  0x18   :  { %p473_p10 = pnand %p471_p9, %p468_p8 }
  0x1a   :  { %476 = shalt.err (!%p473_p10)
}
  0x1b   :  { %s477_s16 = scalar_lea.vmem %s578_s21, 128  ;;  %s481_s1 = scalar_lea.vmem %s578_s21, 256 }
  0x1c   :  { %p478_p11 = scmp.ne.s32.totalorder %s578_s21, %s477_s16  ;;  %p482_p12 = scmp.lt.s32.totalorder %s578_s21, %s578_s21 }
  0x1d   :  { %p483_p13 = scmp.lt.s32.totalorder %s481_s1, %s477_s16 }
  0x1f   :  { %p484_p0 = por %p483_p13, %p482_p12 }
  0x21   :  { %p485_p1 = pnand %p484_p0, %p478_p11 }
  0x23   :  { %488 = shalt.err (!%p485_p1)
}
  0x24   :  { %24 = dma.hbm_to_vmem [thread:$0]  %s646_s0, 128, %s578_s21, [#allocation3], %s541_s30, %s541_s30, %s542_s6  }
  0x25   :  { %s543_s19 = smov [#allocation7]   ;;  %s489_s24 = scalar_lea.hbm %s649_s3, 2048 }
  0x26   :  { %s44_s20 = sshll.u32 %s543_s19, 4  ;;  %p490_p2 = scmp.ne.s32.totalorder %s649_s3, %s489_s24  ;;  %s45_s20 = int_to_ptr.vmem [resolvable:$true] %s44_s20 }
  0x27   :  { %p493_p3 = scmp.lt.u32.totalorder %s489_s24, %s649_s3 }
  0x29   :  { %p495_p4 = pnand %p493_p3, %p490_p2 }
  0x2b   :  { %498 = shalt.err (!%p495_p4)
}
  0x2c   :  { %s499_s29 = scalar_lea.vmem %s45_s20, 2048  ;;  %p504_p6 = scmp.lt.s32.totalorder %s45_s20, %s45_s20 }
  0x2d   :  { %p500_p5 = scmp.ne.s32.totalorder %s45_s20, %s499_s29  ;;  %p505_p7 = scmp.lt.s32.totalorder %s499_s29, %s499_s29 }
  0x2f   :  { %p506_p8 = por %p505_p7, %p504_p6 }
  0x31   :  { %p507_p9 = pnand %p506_p8, %p500_p5 }
  0x33   :  { %510 = shalt.err (!%p507_p9)
}
  0x34   :  { %s544_s0 = smov 64   ;;  %s545_s21 = smov 4  }
  0x35   :  { %50 = dma.hbm_to_vmem [thread:$0]  %s649_s3, 2048, %s45_s20, [#allocation6], %s544_s0, %s544_s0, %s545_s21  }
  0x36   :  { %533 = dma.done.wait [#allocation3], 256  }
  0x37   :  { %534 = vsyncadd [#allocation3], 4294967040 }
  0x38   :  { %535 = dma.done.wait [#allocation6], 2560  }
  0x39   :  { %536 = vsyncadd [#allocation6], 4294964736  ;;  %v546_v0 = vmov 0   ;;  %v423_v1 = vld [vmem:[#allocation5 + $0x4] ss:$8 sps:$4 sm:$0xff]   ;;  %v63_v5 = vld [vmem:[#allocation2] sm:$0xff]  ;;  %v72_v24 = vlaneseq }
  0x3a   :  { %138 = vmatprep.mubr.bf16.mxu0 %v546_v0  ;;  %v425_v2 = vld [vmem:[#allocation5] ss:$8 sps:$4 sm:$0xff]   ;;  %106 = vmatprep.subr.bf16.mxu0 %v423_v1  ;;  %v426_v3 = vld [vmem:[#allocation5 + $0x14] ss:$8 sps:$4 sm:$0xff]   ;;  %v428_v4 = vld [vmem:[#allocation5 + $0x10] ss:$8 sps:$4 sm:$0xff]  }
  0x3b   :  { %107 = vmatpush1.bf16.msra.mxu0 %v425_v2  ;;  %v64_v6 = vld [vmem:[#allocation2 + $0x8] sm:$0xff]  ;;  %v429_v7 = vld [vmem:[#allocation7 + $0x40] sm:$0xff]   ;;  %v431_v10 = vld [vmem:[#allocation7 + $0x48] sm:$0xff]   ;;  %vm102_vm0 = vcmask 261120   ;;  %v73_v25 = vshrl.u32 %v72_v24, 7 }
  0x3c   :  { %108 = vmatprep.subr.bf16.mxu0 %v426_v3  ;;  %v430_v8 = vld [vmem:[#allocation7] sm:$0xff]   ;;  %v65_v9 = vpack.c.bf16 %v64_v6, %v63_v5  ;;  %392 = vmatprep.subr.bf16.mxu1 %v429_v7  ;;  %v432_v11 = vld [vmem:[#allocation7 + $0x8] sm:$0xff]   ;;  %v433_v12 = vld [vmem:[#allocation7 + $0x50] sm:$0xff]  }
  0x3d   :  { %393 = vmatpush3.bf16.msra.mxu1 %v430_v8  ;;  %v434_v13 = vld [vmem:[#allocation7 + $0x10] sm:$0xff]   ;;  %v435_v14 = vld [vmem:[#allocation7 + $0x58] sm:$0xff]   ;;  %v437_v16 = vld [vmem:[#allocation7 + $0x60] sm:$0xff]   ;;  %v74_v26 = vsub.s32 0, %v73_v25  ;;  %v78_v28 = vsub.s32 1, %v73_v25 }
  0x3e   :  { %394 = vmatprep.subr.bf16.mxu1 %v431_v10  ;;  %v436_v15 = vld [vmem:[#allocation7 + $0x18] sm:$0xff]   ;;  %v438_v17 = vld [vmem:[#allocation7 + $0x20] sm:$0xff]   ;;  %v439_v18 = vld [vmem:[#allocation7 + $0x68] sm:$0xff]  }
  0x3f   :  { %109 = vmatpush1.bf16.msra.mxu0 %v428_v4  ;;  %v440_v19 = vld [vmem:[#allocation7 + $0x28] sm:$0xff]   ;;  %v441_v20 = vld [vmem:[#allocation7 + $0x70] sm:$0xff]   ;;  %v443_v22 = vld [vmem:[#allocation7 + $0x78] sm:$0xff]  }
  0x40   :  { %v442_v21 = vld [vmem:[#allocation7 + $0x30] sm:$0xff]   ;;  %v444_v23 = vld [vmem:[#allocation7 + $0x38] sm:$0xff]  }
  0x41   :  { %395 = vmatpush3.bf16.msra.mxu1 %v432_v11  ;;  %v70_v27 = vld [vmem:[%s648_s2] sm:$0x3] }
  0x42   :  { %365 = vmatmul.mubr.msk.bf16.vlgmr.msra.gmra.mrb[0].mxu0 %vm102_vm0, %v65_v9  ;;  %396 = vmatprep.subr.bf16.mxu1 %v433_v12  ;;  %v75_v29 = vrot.slane %v70_v27, %v74_v26  ;;  %v79_v30 = vrot.slane %v70_v27, %v78_v28  ;;  %v366_v46 = vld [vmem:[%s650_s4] ss:$0 sm:$0xff] }
  0x45   :  { %397 = vmatpush3.bf16.msra.mxu1 %v434_v13 }
  0x46   :  { %398 = vmatprep.subr.bf16.mxu1 %v435_v14 }
  0x49   :  { %399 = vmatpush3.bf16.msra.mxu1 %v436_v15 }
  0x4a   :  { %400 = vmatprep.subr.bf16.mxu1 %v437_v16 }
  0x4d   :  { %401 = vmatpush3.bf16.msra.mxu1 %v438_v17 }
  0x4e   :  { %402 = vmatprep.subr.bf16.mxu1 %v439_v18 }
  0x51   :  { %403 = vmatpush3.bf16.msra.mxu1 %v440_v19 }
  0x52   :  { %404 = vmatprep.subr.bf16.mxu1 %v441_v20 }
  0x55   :  { %405 = vmatpush3.bf16.msra.mxu1 %v442_v21 }
  0x56   :  { %406 = vmatprep.subr.bf16.mxu1 %v443_v22 }
  0x59   :  { %407 = vmatpush3.bf16.msra.mxu1 %v444_v23 }
 0x115   :  { %v140_v31 = vpop.f32.mrb[0].mxu0 }
 0x116   :  { %v141_v32 = vadd.f32 %v140_v31, %v75_v29  ;;  %v142_v33 = vpop.f32.mrb[1].mxu0 }
 0x117   :  { %v143_v34 = vadd.f32 %v142_v33, %v79_v30  ;;  %v144_v35 = vpop.f32.mrb[2].mxu0 }
 0x118   :  { %v145_v36 = vadd.f32 %v144_v35, %v75_v29  ;;  %v146_v37 = vpop.f32.mrb[3].mxu0  ;;  %v149_v39 = vmax.f32 %v141_v32, 0.0 }
 0x119   :  { %v147_v38 = vadd.f32 %v146_v37, %v79_v30  ;;  %v150_v41 = vmax.f32 %v143_v34, 0.0 }
 0x11a   :  { %v151_v40 = vmax.f32 %v145_v36, 0.0 }
 0x11b   :  { %v152_v42 = vmax.f32 %v147_v38, 0.0 }
 0x11c   :  { %v153_v43 = vpack.c.bf16 %v151_v40, %v149_v39 }
 0x11d   :  { %v154_v44 = vpack.c.bf16 %v152_v42, %v150_v41 }
 0x11f   :  { %322 = vmatprep.mubr.bf16.mxu1 %v154_v44 }
 0x120   :  { %323 = vmatmul.mubr.bf16.vlgmr.msra.gmra.mrb[0].mxu1 %v153_v43 }
 0x1f3   :  { %v408_v45 = vpop.f32.mrb[0].mxu1 }
 0x1f4   :  { %v409_v47 = vpop.f32.mrb[1].mxu1 }
 0x1f5   :  { %v410_v48 = vadd.f32 %v409_v47, %v408_v45  ;;  %v411_v49 = vpop.f32.mrb[2].mxu1 }
 0x1f6   :  { %v412_v50 = vpop.f32.mrb[3].mxu1 }
 0x1f7   :  { %v325_v51 = vadd.f32 %v410_v48, %v366_v46  ;;  %v413_v52 = vadd.f32 %v412_v50, %v411_v49 }
 0x1f9   :  { %v328_v53 = vadd.f32 %v413_v52, %v366_v46  ;;  %v331_v54 = vmax.f32 %v325_v51, 0.0 }
 0x1fb   :  { %v332_v55 = vmax.f32 %v328_v53, 0.0 }
 0x1fd   :  { %v390_v56 = vpack.c.bf16 %v332_v55, %v331_v54 }
 0x1ff   :  { %391 = vst [vmem:[#allocation8] sm:$0xff] %v390_v56  }
 0x200   :  { %347 = vsyncadd [#allocation4], 64  ;;  %s547_s9 = smov [#allocation8]  }
 0x201   :  { %s348_s10 = sshll.u32 %s547_s9, 4  ;;  %s349_s10 = int_to_ptr.vmem [resolvable:$true] %s348_s10 }
 0x202   :  { %s511_s11 = scalar_lea.vmem %s349_s10, 64  ;;  %s515_s12 = scalar_lea.vmem %s349_s10, 128 }
 0x203   :  { %p512_p10 = scmp.ne.s32.totalorder %s349_s10, %s511_s11  ;;  %p516_p11 = scmp.lt.s32.totalorder %s349_s10, %s349_s10 }
 0x204   :  { %p517_p12 = scmp.lt.s32.totalorder %s515_s12, %s511_s11 }
 0x206   :  { %p518_p13 = por %p517_p12, %p516_p11 }
 0x208   :  { %p519_p0 = pnand %p518_p13, %p512_p10 }
 0x20a   :  { %522 = shalt.err (!%p519_p0)
}
 0x20b   :  { %s523_s14 = scalar_lea.hbm %s651_s5, 64 }
 0x20c   :  { %p524_p1 = scmp.ne.s32.totalorder %s651_s5, %s523_s14  ;;  %p527_p2 = scmp.lt.u32.totalorder %s523_s14, %s651_s5 }
 0x20e   :  { %p529_p3 = pnand %p527_p2, %p524_p1 }
 0x210   :  { %532 = shalt.err (!%p529_p3)
}
 0x211   :  { %354 = dma.vmem_to_hbm [thread:$0]  %s349_s10, 64, %s651_s5, [#allocation4], %s544_s0, %s544_s0, %s545_s21  }
 0x212   :  { %537 = dma.done.wait [#allocation4], 128  }
 0x213   :  { %538 = vsyncadd [#allocation4], 4294967168 }
 0x214   :  { %358 = vsyncpa [#allocation3], 1 }
 0x215   :  { %359 = vsyncpa [#allocation6], 1 }
 0x216   :  { %360 = vsyncpa [#allocation4], 1 }

</bundles_post_ra>
